<compile_context>
chip_gen: v7x
topology: tpu7x:2x2x1
jax: 0.10.0
libtpu: 0.0.40
codegen_flags: <defaults>
</compile_context>

<pallas_src>
import functools

import jax
import jax.numpy as jnp
from jax import lax
from jax.experimental import pallas as pl
from jax.experimental.pallas import tpu as pltpu

_EPS = 1e-8  # PyTorch F.cosine_similarity default eps


def _round_up(x, m):
    return ((x + m - 1) // m) * m


def _triplet_cosine_kernel(a_ref, p_ref, n_ref, out_ref, *,
                           margin, batch_size, tile_rows):
    i = pl.program_id(0)

    # Upcast (supports bf16 inputs); reductions run in f32.
    a = a_ref[...].astype(jnp.float32)
    p = p_ref[...].astype(jnp.float32)
    n = n_ref[...].astype(jnp.float32)

    dot_ap = jnp.sum(a * p, axis=1, keepdims=True)  # (TB, 1)
    dot_an = jnp.sum(a * n, axis=1, keepdims=True)  # (TB, 1)
    saa = jnp.sum(a * a, axis=1, keepdims=True)     # (TB, 1)
    spp = jnp.sum(p * p, axis=1, keepdims=True)     # (TB, 1)
    snn = jnp.sum(n * n, axis=1, keepdims=True)     # (TB, 1)

    # cos(x, y) = dot / max(||x||*||y||, eps)
    #           = dot * rsqrt(max(||x||^2 * ||y||^2, eps^2))
    sim_ap = dot_ap * lax.rsqrt(jnp.maximum(saa * spp, _EPS * _EPS))
    sim_an = dot_an * lax.rsqrt(jnp.maximum(saa * snn, _EPS * _EPS))

    # (1 - sim_ap) - (1 - sim_an) + margin == sim_an - sim_ap + margin
    hinge = jnp.maximum(sim_an - sim_ap + margin, 0.0)  # (TB, 1)

    # Zero out padded rows (when B is not a multiple of the tile size) so the
    # wrapper's sum/B stays the exact mean over real rows.
    row = i * tile_rows + lax.broadcasted_iota(jnp.int32, hinge.shape, 0)
    hinge = jnp.where(row < batch_size, hinge, 0.0)

    out_ref[...] = hinge


def triplet_loss_cosine(anchor, positive, negative, margin, *, tile_rows=512):
    """Pallas TPU TripletLossCosine: returns a scalar f32 loss."""
    B, D = anchor.shape
    assert positive.shape == (B, D) and negative.shape == (B, D)

    # Batch tile: keep 3 double-buffered (TB, D) input tiles under ~12 MiB so
    # the kernel fits default scoped VMEM on v5e/v6e/v7x alike.
    itemsize = jnp.dtype(anchor.dtype).itemsize
    bytes_per_row = 3 * 2 * D * itemsize
    vmem_budget = 12 * 1024 * 1024
    tb_cap = max(8, (vmem_budget // bytes_per_row) // 8 * 8)
    tb = int(min(tile_rows, tb_cap, _round_up(B, 8)))

    padded_b = _round_up(B, tb)
    if padded_b != B:
        pad = ((0, padded_b - B), (0, 0))
        anchor = jnp.pad(anchor, pad)
        positive = jnp.pad(positive, pad)
        negative = jnp.pad(negative, pad)
    num_tiles = padded_b // tb

    kernel = functools.partial(
        _triplet_cosine_kernel,
        margin=float(margin),
        batch_size=B,
        tile_rows=tb,
    )

    per_row_hinge = pl.pallas_call(
        kernel,
        out_shape=jax.ShapeDtypeStruct((padded_b, 1), jnp.float32),
        grid_spec=pltpu.PrefetchScalarGridSpec(
            num_scalar_prefetch=0,
            grid=(num_tiles,),
            in_specs=[
                pl.BlockSpec((tb, D), lambda i: (i, 0)),
                pl.BlockSpec((tb, D), lambda i: (i, 0)),
                pl.BlockSpec((tb, D), lambda i: (i, 0)),
            ],
            out_specs=pl.BlockSpec((tb, 1), lambda i: (i, 0)),
        ),
        compiler_params=pltpu.CompilerParams(
            dimension_semantics=("parallel",),  # lets both TCs run tiles on v7x
        ),
    )(anchor, positive, negative)

    # Tiny final reduction in XLA (padded rows are already zeroed in-kernel).
    return jnp.sum(per_row_hinge) * (1.0 / B)


if __name__ == "__main__":
    key = jax.random.PRNGKey(0)
    k_a, k_p, k_n = jax.random.split(key, 3)

    # Small, deterministic embeddings; B=10 deliberately not a multiple of 8
    # to exercise the padding + in-kernel masking path.
    B, D = 10, 32
    MARGIN = 0.5

    anchor = jax.random.normal(k_a, (B, D), dtype=jnp.float32)
    positive = jax.random.normal(k_p, (B, D), dtype=jnp.float32)
    negative = jax.random.normal(k_n, (B, D), dtype=jnp.float32)

    loss = triplet_loss_cosine(anchor, positive, negative, MARGIN)
    jax.block_until_ready(loss)

    # Pure-JAX reference (same semantics as the PyTorch module).
    def ref(a, p, n, m):
        def cos(x, y):
            dot = jnp.sum(x * y, axis=1)
            nx = jnp.linalg.norm(x, axis=1)
            ny = jnp.linalg.norm(y, axis=1)
            return dot / jnp.maximum(nx * ny, _EPS)
        d_pos = 1.0 - cos(a, p)
        d_neg = 1.0 - cos(a, n)
        return jnp.mean(jnp.maximum(d_pos - d_neg + m, 0.0))

    ref_loss = ref(anchor, positive, negative, MARGIN)
    assert jnp.allclose(loss, ref_loss, rtol=1e-5, atol=1e-6), (loss, ref_loss)

    print("KERNEL_OK")
</pallas_src>

<mosaic_0001>
module attributes {stable_mosaic.version = 11 : i64} {
  func.func @_triplet_cosine_kernel(%arg0: i32, %arg1: memref<16x32xf32, #tpu.memory_space<vmem>>, %arg2: memref<16x32xf32, #tpu.memory_space<vmem>>, %arg3: memref<16x32xf32, #tpu.memory_space<vmem>>, %arg4: memref<16x1xf32, #tpu.memory_space<vmem>>) attributes {dimension_semantics = [#tpu.dimension_semantics<parallel>], iteration_bounds = array<i64: 1>, scalar_prefetch = 0 : i64, scratch_operands = 0 : i64, tpu.core_type = #tpu.core_type<tc>, window_params = [{transform_indices = @transform_0, window_bounds = array<i64: 16, 32>}, {transform_indices = @transform_1, window_bounds = array<i64: 16, 32>}, {transform_indices = @transform_2, window_bounds = array<i64: 16, 32>}, {transform_indices = @transform_3, window_bounds = array<i64: 16, 1>}]} {
    %c0 = arith.constant 0 : index
    %c0_0 = arith.constant 0 : index
    %0 = vector.load %arg1[%c0, %c0_0] : memref<16x32xf32, #tpu.memory_space<vmem>>, vector<16x32xf32>
    %c0_1 = arith.constant 0 : index
    %c0_2 = arith.constant 0 : index
    %1 = vector.load %arg2[%c0_1, %c0_2] : memref<16x32xf32, #tpu.memory_space<vmem>>, vector<16x32xf32>
    %c0_3 = arith.constant 0 : index
    %c0_4 = arith.constant 0 : index
    %2 = vector.load %arg3[%c0_3, %c0_4] : memref<16x32xf32, #tpu.memory_space<vmem>>, vector<16x32xf32>
    %3 = arith.mulf %0, %1 : vector<16x32xf32>
    %cst = arith.constant dense<0.000000e+00> : vector<16xf32>
    %4 = vector.multi_reduction <add>, %3, %cst [1] : vector<16x32xf32> to vector<16xf32>
    %5 = vector.shape_cast %4 : vector<16xf32> to vector<16x1xf32>
    %6 = arith.mulf %0, %2 : vector<16x32xf32>
    %cst_5 = arith.constant dense<0.000000e+00> : vector<16xf32>
    %7 = vector.multi_reduction <add>, %6, %cst_5 [1] : vector<16x32xf32> to vector<16xf32>
    %8 = vector.shape_cast %7 : vector<16xf32> to vector<16x1xf32>
    %9 = arith.mulf %0, %0 : vector<16x32xf32>
    %cst_6 = arith.constant dense<0.000000e+00> : vector<16xf32>
    %10 = vector.multi_reduction <add>, %9, %cst_6 [1] : vector<16x32xf32> to vector<16xf32>
    %11 = vector.shape_cast %10 : vector<16xf32> to vector<16x1xf32>
    %12 = arith.mulf %1, %1 : vector<16x32xf32>
    %cst_7 = arith.constant dense<0.000000e+00> : vector<16xf32>
    %13 = vector.multi_reduction <add>, %12, %cst_7 [1] : vector<16x32xf32> to vector<16xf32>
    %14 = vector.shape_cast %13 : vector<16xf32> to vector<16x1xf32>
    %15 = arith.mulf %2, %2 : vector<16x32xf32>
    %cst_8 = arith.constant dense<0.000000e+00> : vector<16xf32>
    %16 = vector.multi_reduction <add>, %15, %cst_8 [1] : vector<16x32xf32> to vector<16xf32>
    %17 = vector.shape_cast %16 : vector<16xf32> to vector<16x1xf32>
    %18 = arith.mulf %11, %14 : vector<16x1xf32>
    %cst_9 = arith.constant 1.000000e-16 : f32
    %19 = vector.broadcast %cst_9 : f32 to vector<16x1xf32>
    %20 = arith.maximumf %18, %19 : vector<16x1xf32>
    %21 = math.rsqrt %20 : vector<16x1xf32>
    %22 = arith.mulf %5, %21 : vector<16x1xf32>
    %23 = arith.mulf %11, %17 : vector<16x1xf32>
    %cst_10 = arith.constant 1.000000e-16 : f32
    %24 = vector.broadcast %cst_10 : f32 to vector<16x1xf32>
    %25 = arith.maximumf %23, %24 : vector<16x1xf32>
    %26 = math.rsqrt %25 : vector<16x1xf32>
    %27 = arith.mulf %8, %26 : vector<16x1xf32>
    %28 = arith.subf %27, %22 : vector<16x1xf32>
    %cst_11 = arith.constant 5.000000e-01 : f32
    %29 = vector.broadcast %cst_11 : f32 to vector<16x1xf32>
    %30 = arith.addf %28, %29 : vector<16x1xf32>
    %cst_12 = arith.constant 0.000000e+00 : f32
    %31 = vector.broadcast %cst_12 : f32 to vector<16x1xf32>
    %32 = arith.maximumf %30, %31 : vector<16x1xf32>
    %c16_i32 = arith.constant 16 : i32
    %33 = arith.muli %arg0, %c16_i32 : i32
    %34 = tpu.iota {dimensions = array<i32: 0>} : vector<16x1xi32>
    %35 = vector.broadcast %33 : i32 to vector<16x1xi32>
    %36 = arith.addi %35, %34 : vector<16x1xi32>
    %c10_i32 = arith.constant 10 : i32
    %37 = vector.broadcast %c10_i32 : i32 to vector<16x1xi32>
    %38 = arith.cmpi slt, %36, %37 : vector<16x1xi32>
    %cst_13 = arith.constant 0.000000e+00 : f32
    %39 = vector.broadcast %cst_13 : f32 to vector<16x1xf32>
    %40 = arith.select %38, %32, %39 : vector<16x1xi1>, vector<16x1xf32>
    %c0_14 = arith.constant 0 : index
    %c0_15 = arith.constant 0 : index
    %41 = vector.load %arg4[%c0_14, %c0_15] : memref<16x1xf32, #tpu.memory_space<vmem>>, vector<16x1xf32>
    tpu.vector_store %arg4[%c0_14, %c0_15], %40 {strides = array<i32>} : memref<16x1xf32, #tpu.memory_space<vmem>>, vector<16x1xf32>,
    return
  }
  func.func @transform_0(%arg0: i32) -> (i32, i32) {
    %c0_i32 = arith.constant 0 : i32
    %c0_i32_0 = arith.constant 0 : i32
    return %arg0, %c0_i32 : i32, i32
  }
  func.func @transform_1(%arg0: i32) -> (i32, i32) {
    %c0_i32 = arith.constant 0 : i32
    %c0_i32_0 = arith.constant 0 : i32
    return %arg0, %c0_i32 : i32, i32
  }
  func.func @transform_2(%arg0: i32) -> (i32, i32) {
    %c0_i32 = arith.constant 0 : i32
    %c0_i32_0 = arith.constant 0 : i32
    return %arg0, %c0_i32 : i32, i32
  }
  func.func @transform_3(%arg0: i32) -> (i32, i32) {
    %c0_i32 = arith.constant 0 : i32
    %c0_i32_0 = arith.constant 0 : i32
    return %arg0, %c0_i32 : i32, i32
  }
}

</mosaic_0001>

<bundles_post_ra>
// kernel: tpu_custom_call.1
= control target key start
LH: loop header
LB: loop body
LE: loop exit
PB: predicated region body
PF: predicated region fallthrough
CT: control target
= control target key end

     0   :  { %8 = vsyncpa [#allocation3], 0  ;;  %s320_s0 = inlined_call_operand.hbm [shape: f32[16,32], index: 0, kind: input, shape index: {}]   ;;  %s321_s1 = inlined_call_operand.hbm [shape: f32[16,32], index: 1, kind: input, shape index: {}]   ;;  %s322_s2 = inlined_call_operand.hbm [shape: f32[16,32], index: 2, kind: input, shape index: {}]   ;;  %s323_s3 = inlined_call_operand.vmem [shape: f32[16,1], index: 3, kind: output, shape index: {}]  }
   0x1   :  { %9 = vsyncpa [#allocation5], 0  ;;  %s227_s12 = smov [#allocation4]   ;;  %s228_s14 = smov [#allocation2]  }
   0x2   :  { %s27_s13 = sshll.u32 %s227_s12, 4  ;;  %s15_s15 = sshll.u32 %s228_s14, 4  ;;  %s28_s13 = int_to_ptr.vmem [resolvable:$true] %s27_s13  ;;  %s252_s15 = int_to_ptr.vmem [resolvable:$true] %s15_s15 }
   0x3   :  { %s157_s18 = scalar_lea.hbm %s321_s1, 256 }
   0x4   :  { %p158_p0 = scmp.ne.s32.totalorder %s321_s1, %s157_s18  ;;  %p161_p1 = scmp.lt.u32.totalorder %s157_s18, %s321_s1 }
   0x6   :  { %p163_p2 = pnand %p161_p1, %p158_p0 }
   0x8   :  { %166 = shalt.err (!%p163_p2)
}
   0x9   :  { %s167_s23 = scalar_lea.vmem %s28_s13, 256  ;;  %p172_p4 = scmp.lt.s32.totalorder %s28_s13, %s28_s13 }
   0xa   :  { %p168_p3 = scmp.ne.s32.totalorder %s28_s13, %s167_s23  ;;  %p173_p5 = scmp.lt.s32.totalorder %s167_s23, %s167_s23 }
   0xc   :  { %p174_p6 = por %p173_p5, %p172_p4 }
   0xe   :  { %p175_p7 = pnand %p174_p6, %p168_p3 }
  0x10   :  { %178 = shalt.err (!%p175_p7)
}
  0x11   :  { %s229_s24 = smov 128   ;;  %s230_s25 = smov 8  }
  0x12   :  { %33 = dma.hbm_to_vmem [thread:$0]  %s321_s1, 256, %s28_s13, [#allocation5], %s229_s24, %s229_s24, %s230_s25  }
  0x13   :  { %s179_s30 = scalar_lea.hbm %s320_s0, 256 }
  0x14   :  { %p180_p8 = scmp.ne.s32.totalorder %s320_s0, %s179_s30  ;;  %p183_p9 = scmp.lt.u32.totalorder %s179_s30, %s320_s0 }
  0x16   :  { %p185_p10 = pnand %p183_p9, %p180_p8 }
  0x18   :  { %188 = shalt.err (!%p185_p10)
}
  0x19   :  { %s189_s8 = scalar_lea.vmem %s252_s15, 256  ;;  %p194_p12 = scmp.lt.s32.totalorder %s252_s15, %s252_s15 }
  0x1a   :  { %p190_p11 = scmp.ne.s32.totalorder %s252_s15, %s189_s8  ;;  %p195_p13 = scmp.lt.s32.totalorder %s189_s8, %s189_s8 }
  0x1c   :  { %p196_p0 = por %p195_p13, %p194_p12 }
  0x1e   :  { %p197_p1 = pnand %p196_p0, %p190_p11 }
  0x20   :  { %200 = shalt.err (!%p197_p1)
}
  0x21   :  { %21 = dma.hbm_to_vmem [thread:$0]  %s320_s0, 256, %s252_s15, [#allocation3], %s229_s24, %s229_s24, %s230_s25  }
  0x22   :  { %s231_s10 = smov [#allocation6]   ;;  %s201_s14 = scalar_lea.hbm %s322_s2, 256 }
  0x23   :  { %s39_s11 = sshll.u32 %s231_s10, 4  ;;  %p202_p2 = scmp.ne.s32.totalorder %s322_s2, %s201_s14  ;;  %s40_s11 = int_to_ptr.vmem [resolvable:$true] %s39_s11 }
  0x24   :  { %p205_p3 = scmp.lt.u32.totalorder %s201_s14, %s322_s2 }
  0x26   :  { %p207_p4 = pnand %p205_p3, %p202_p2 }
  0x28   :  { %210 = shalt.err (!%p207_p4)
}
  0x29   :  { %s211_s20 = scalar_lea.vmem %s40_s11, 256  ;;  %p216_p6 = scmp.lt.s32.totalorder %s40_s11, %s40_s11 }
  0x2a   :  { %p212_p5 = scmp.ne.s32.totalorder %s40_s11, %s211_s20  ;;  %p217_p7 = scmp.lt.s32.totalorder %s211_s20, %s211_s20 }
  0x2c   :  { %p218_p8 = por %p217_p7, %p216_p6 }
  0x2e   :  { %p219_p9 = pnand %p218_p8, %p212_p5 }
  0x30   :  { %222 = shalt.err (!%p219_p9)
}
  0x31   :  { %45 = dma.hbm_to_vmem [thread:$0]  %s322_s2, 256, %s40_s11, [#allocation5], %s229_s24, %s229_s24, %s230_s25  }
  0x32   :  { %223 = dma.done.wait [#allocation3], 256  }
  0x33   :  { %224 = vsyncadd [#allocation3], 4294967040 }
  0x34   :  { %225 = dma.done.wait [#allocation5], 512  }
  0x35   :  { %226 = vsyncadd [#allocation5], 4294966784  ;;  %v60_v0 = vld [vmem:[#allocation6 + $0x8] sm:$0xff]  ;;  %vm63_vm0 = vcmask 261120   ;;  %v58_v2 = vld [vmem:[#allocation4 + $0x8] sm:$0xff]  ;;  %v125_v40 = vlaneseq  ;;  %vm135_vm2 = vcmask 7168  }
  0x36   :  { %v56_v1 = vld [vmem:[#allocation2 + $0x8] sm:$0xff]  ;;  %v95_v3 = vmul.f32 %v60_v0, %v60_v0  ;;  %v87_v5 = vmul.f32 %v58_v2, %v58_v2  ;;  %v55_v6 = vld [vmem:[#allocation2] sm:$0xff]  ;;  %v57_v8 = vld [vmem:[#allocation4] sm:$0xff] }
  0x37   :  { %v79_v4 = vmul.f32 %v56_v1, %v56_v1  ;;  %v78_v7 = vmul.f32 %v55_v6, %v55_v6  ;;  %v59_v9 = vld [vmem:[#allocation6] sm:$0xff]  ;;  %v86_v14 = vmul.f32 %v57_v8, %v57_v8  ;;  %v71_v18 = vmul.f32 %v60_v0, %v56_v1 }
  0x38   :  { %v99_v10 = vsel %vm63_vm0, %v95_v3, 0.0  ;;  %v91_v12 = vsel %vm63_vm0, %v87_v5, 0.0  ;;  %v94_v15 = vmul.f32 %v59_v9, %v59_v9  ;;  %v62_v19 = vmul.f32 %v58_v2, %v56_v1 }
  0x39   :  { %v83_v11 = vsel %vm63_vm0, %v79_v4, 0.0  ;;  %100 = vadd.xlane.f32.xlu1 %v99_v10  ;;  %v80_v13 = vsel %vm63_vm0, %v78_v7, 0.0  ;;  %v88_v16 = vsel %vm63_vm0, %v86_v14, 0.0  ;;  %v75_v20 = vsel %vm63_vm0, %v71_v18, 0.0 }
  0x3a   :  { %84 = vadd.xlane.f32.xlu0 %v83_v11  ;;  %v96_v17 = vsel %vm63_vm0, %v94_v15, 0.0  ;;  %v67_v21 = vsel %vm63_vm0, %v62_v19, 0.0  ;;  %v70_v22 = vmul.f32 %v59_v9, %v55_v6  ;;  %v61_v23 = vmul.f32 %v57_v8, %v55_v6 }
  0x3b   :  { %v126_v44 = vshrl.u32 %v125_v40, 7 }
  0x3c   :  { %v72_v24 = vsel %vm63_vm0, %v70_v22, 0.0  ;;  %v64_v25 = vsel %vm63_vm0, %v61_v23, 0.0 }
  0x3d   :  { %81 = vadd.xlane.f32.xlu1 %v80_v13  ;;  %v127_v48 = vadd.s32 8, %v126_v44 }
  0x3e   :  { %92 = vadd.xlane.f32.xlu0 %v91_v12 }
  0x3f   :  { %vm132_vm1 = vcmp.lt.s32.totalorder %v127_v48, 10 }
  0x41   :  { %97 = vadd.xlane.f32.xlu1 %v96_v17 }
  0x42   :  { %89 = vadd.xlane.f32.xlu0 %v88_v16 }
  0x45   :  { %76 = vadd.xlane.f32.xlu1 %v75_v20 }
  0x46   :  { %68 = vadd.xlane.f32.xlu0 %v67_v21 }
  0x49   :  { %73 = vadd.xlane.f32.xlu1 %v72_v24 }
  0x4a   :  { %65 = vadd.xlane.f32.xlu0 %v64_v25 }
  0xc6   :  { %v101_v26 = vpop.xlane.xlu1 %100 }
  0xc7   :  { %v85_v27 = vpop.xlane.xlu0 %84 }
  0xc8   :  { %v111_v28 = vmul.f32 %v101_v26, %v85_v27 }
  0xca   :  { %v113_v29 = vmax.f32 %v111_v28, 1e-16  ;;  %v82_v31 = vpop.xlane.xlu1 %81 }
  0xcb   :  { %v93_v30 = vpop.xlane.xlu0 %92 }
  0xcc   :  { %v103_v32 = vmul.f32 %v93_v30, %v85_v27  ;;  %149 = vrsqrt.f32 %v113_v29 }
  0xce   :  { %v105_v33 = vmax.f32 %v103_v32, 1e-16  ;;  %v98_v35 = vpop.xlane.xlu1 %97 }
  0xcf   :  { %v90_v34 = vpop.xlane.xlu0 %89  ;;  %v110_v37 = vmul.f32 %v98_v35, %v82_v31 }
  0xd0   :  { %151 = vrsqrt.f32 %v105_v33  ;;  %v102_v36 = vmul.f32 %v90_v34, %v82_v31 }
  0xd1   :  { %v112_v39 = vmax.f32 %v110_v37, 1e-16 }
  0xd2   :  { %v104_v38 = vmax.f32 %v102_v36, 1e-16  ;;  %v77_v43 = vpop.xlane.xlu1 %76 }
  0xd3   :  { %v69_v41 = vpop.xlane.xlu0 %68 }
  0xd4   :  { %153 = vrsqrt.f32 %v104_v38 }
  0xd5   :  { %155 = vrsqrt.f32 %v112_v39 }
  0xd6   :  { %v150_v42 = vpop.eup %149  ;;  %v74_v51 = vpop.xlane.xlu1 %73 }
  0xd7   :  { %v117_v46 = vmul.f32 %v150_v42, %v77_v43  ;;  %v66_v49 = vpop.xlane.xlu0 %65 }
  0xda   :  { %v152_v45 = vpop.eup %151 }
  0xdb   :  { %v109_v47 = vmul.f32 %v152_v45, %v69_v41 }
  0xdd   :  { %v119_v50 = vsub.f32 %v117_v46, %v109_v47 }
  0xde   :  { %v154_v52 = vpop.eup %153 }
  0xdf   :  { %v156_v53 = vpop.eup %155  ;;  %v121_v54 = vadd.f32 0.5, %v119_v50  ;;  %v108_v55 = vmul.f32 %v154_v52, %v66_v49 }
  0xe0   :  { %v116_v56 = vmul.f32 %v156_v53, %v74_v51 }
  0xe1   :  { %v123_v57 = vmax.f32 %v121_v54, 0.0 }
  0xe2   :  { %v118_v58 = vsub.f32 %v116_v56, %v108_v55 }
  0xe3   :  { %v134_v59 = vsel %vm132_vm1, %v123_v57, 0.0 }
  0xe4   :  { %137 = vst.msk [vmem:[%s323_s3 + $0x8] sm:$0xff] %vm135_vm2, %v134_v59  ;;  %v120_v60 = vadd.f32 0.5, %v118_v58 }
  0xe6   :  { %v122_v61 = vmax.f32 %v120_v60, 0.0 }
  0xe8   :  { %136 = vst.msk [vmem:[%s323_s3] sm:$0xff] %vm135_vm2, %v122_v61 }
  0xe9   :  { %142 = vsyncpa [#allocation3], 1 }
  0xea   :  { %143 = vsyncpa [#allocation5], 1 }

</bundles_post_ra>
